<compile_context>
chip_gen: v7x
topology: tpu7x:2x2x1
jax: 0.10.0
libtpu: 0.0.40
codegen_flags: <defaults>
</compile_context>

<pallas_src>
import functools

import jax
import jax.numpy as jnp
from jax.experimental import pallas as pl
from jax.experimental.pallas import tpu as pltpu


def _linear_kernel(x_ref, w_ref, b_ref, o_ref, acc_ref):
    # x_ref: (tm, tk), w_ref: (tn, tk)  [PyTorch layout, contract last axes],
    # b_ref: (1, tn), o_ref: (tm, tn), acc_ref: (tm, tn) f32 scratch.
    k = pl.program_id(2)

    @pl.when(k == 0)
    def _():
        acc_ref[...] = jnp.zeros_like(acc_ref)

    acc_ref[...] += jax.lax.dot_general(
        x_ref[...],
        w_ref[...],
        dimension_numbers=(((1,), (1,)), ((), ())),  # x @ W.T on native layout
        preferred_element_type=jnp.float32,
    )

    @pl.when(k == pl.num_programs(2) - 1)
    def _():
        o_ref[...] = (acc_ref[...] + b_ref[...]).astype(o_ref.dtype)


def _round_up(v, m):
    return ((v + m - 1) // m) * m


@functools.partial(jax.jit, static_argnames=("tm", "tn", "tk"))
def simple_policy_forward(x, weight, bias, *, tm=256, tn=256, tk=512):
    """Pallas equivalent of SimplePolicy.forward (y = x @ W.T + b).

    Args:
      x:      [batch, input_dim] float32
      weight: [output_dim, input_dim] float32 (PyTorch nn.Linear convention)
      bias:   [output_dim] float32
    Returns:
      [batch, output_dim] float32
    """
    batch, input_dim = x.shape
    output_dim = weight.shape[0]

    # Clamp tile sizes to the (8, 128)-aligned problem size so small problems
    # do not over-pad, while large problems get full 256/512 tiles.
    tm_ = min(tm, _round_up(batch, 8))
    tn_ = min(tn, _round_up(output_dim, 128))
    tk_ = min(tk, _round_up(input_dim, 128))

    M = _round_up(batch, tm_)
    N = _round_up(output_dim, tn_)   # lane-dense output (multiple of 128)
    K = _round_up(input_dim, tk_)

    # Zero-padding keeps the math exact: padded K contributes 0 to the dot,
    # padded N columns (weight rows + bias) are 0 and sliced off below.
    x_p = jnp.pad(x, ((0, M - batch), (0, K - input_dim)))
    w_p = jnp.pad(weight, ((0, N - output_dim), (0, K - input_dim)))
    b_p = jnp.pad(bias, (0, N - output_dim)).reshape(1, N)

    grid = (M // tm_, N // tn_, K // tk_)

    out = pl.pallas_call(
        _linear_kernel,
        out_shape=jax.ShapeDtypeStruct((M, N), x.dtype),
        grid_spec=pltpu.PrefetchScalarGridSpec(
            num_scalar_prefetch=0,
            grid=grid,
            in_specs=[
                pl.BlockSpec((tm_, tk_), lambda i, j, k: (i, k)),   # x
                pl.BlockSpec((tn_, tk_), lambda i, j, k: (j, k)),   # W (native)
                pl.BlockSpec((1, tn_), lambda i, j, k: (0, j)),     # bias
            ],
            out_specs=pl.BlockSpec((tm_, tn_), lambda i, j, k: (i, j)),
            scratch_shapes=[pltpu.VMEM((tm_, tn_), jnp.float32)],
        ),
        compiler_params=pltpu.CompilerParams(
            dimension_semantics=("parallel", "parallel", "arbitrary"),
            vmem_limit_bytes=32 * 1024 * 1024,  # safe on v5e/v6e/v7x
        ),
        cost_estimate=pl.CostEstimate(
            flops=2 * M * N * K,
            transcendentals=0,
            bytes_accessed=4 * (M * K + N * K + M * N + N),
        ),
    )(x_p, w_p, b_p)

    return out[:batch, :output_dim]


def init_params(key, input_dim, output_dim):
    """Deterministic params matching nn.Linear + xavier_normal_(gain=1)."""
    k_w, k_b = jax.random.split(key)
    # Xavier normal: std = gain * sqrt(2 / (fan_in + fan_out))
    std = (2.0 / (input_dim + output_dim)) ** 0.5
    weight = std * jax.random.normal(k_w, (output_dim, input_dim), jnp.float32)
    # nn.Linear default bias init: U(-1/sqrt(fan_in), 1/sqrt(fan_in))
    bound = 1.0 / (input_dim ** 0.5)
    bias = jax.random.uniform(
        k_b, (output_dim,), jnp.float32, minval=-bound, maxval=bound
    )
    return weight, bias


if __name__ == "__main__":
    key = jax.random.PRNGKey(0)
    k_x, k_p = jax.random.split(key)

    batch, input_dim, output_dim = 8, 32, 16
    x = jax.random.normal(k_x, (batch, input_dim), jnp.float32)
    weight, bias = init_params(k_p, input_dim, output_dim)

    out = simple_policy_forward(x, weight, bias)
    jax.block_until_ready(out)

    # Sanity check against plain-JAX reference (PyTorch semantics).
    ref = x @ weight.T + bias
    assert out.shape == (batch, output_dim)
    assert jnp.allclose(out, ref, atol=1e-5, rtol=1e-5)

    print("KERNEL_OK")
</pallas_src>

<mosaic_0001>
module attributes {stable_mosaic.version = 11 : i64} {
  func.func @_linear_kernel(%arg0: i32, %arg1: i32, %arg2: i32, %arg3: memref<8x128xf32, #tpu.memory_space<vmem>>, %arg4: memref<128x128xf32, #tpu.memory_space<vmem>>, %arg5: memref<1x128xf32, #tpu.memory_space<vmem>>, %arg6: memref<8x128xf32, #tpu.memory_space<vmem>>, %arg7: memref<8x128xf32, #tpu.memory_space<vmem>>) attributes {dimension_semantics = [#tpu.dimension_semantics<parallel>, #tpu.dimension_semantics<parallel>, #tpu.dimension_semantics<arbitrary>], iteration_bounds = array<i64: 1, 1, 1>, scalar_prefetch = 0 : i64, scratch_operands = 1 : i64, tpu.core_type = #tpu.core_type<tc>, window_params = [{transform_indices = @transform_0, window_bounds = array<i64: 8, 128>}, {transform_indices = @transform_1, window_bounds = array<i64: 128, 128>}, {transform_indices = @transform_2, window_bounds = array<i64: 1, 128>}, {transform_indices = @transform_3, window_bounds = array<i64: 8, 128>}]} {
    %c0_i32 = arith.constant 0 : i32
    %0 = arith.cmpi eq, %arg2, %c0_i32 : i32
    %1 = arith.extui %0 : i1 to i32
    %c0_i32_0 = arith.constant 0 : i32
    %2 = arith.cmpi ne, %1, %c0_i32_0 : i32
    scf.if %2 {
      %cst_10 = arith.constant 0.000000e+00 : f32
      %12 = vector.broadcast %cst_10 : f32 to vector<8x128xf32>
      %c0_11 = arith.constant 0 : index
      %c0_12 = arith.constant 0 : index
      %13 = vector.load %arg7[%c0_11, %c0_12] : memref<8x128xf32, #tpu.memory_space<vmem>>, vector<8x128xf32>
      tpu.vector_store %arg7[%c0_11, %c0_12], %12 {strides = array<i32>} : memref<8x128xf32, #tpu.memory_space<vmem>>, vector<8x128xf32>,
    } else {
    }
    %c0 = arith.constant 0 : index
    %c0_1 = arith.constant 0 : index
    %3 = vector.load %arg7[%c0, %c0_1] : memref<8x128xf32, #tpu.memory_space<vmem>>, vector<8x128xf32>
    %c0_2 = arith.constant 0 : index
    %c0_3 = arith.constant 0 : index
    %4 = vector.load %arg3[%c0_2, %c0_3] : memref<8x128xf32, #tpu.memory_space<vmem>>, vector<8x128xf32>
    %c0_4 = arith.constant 0 : index
    %c0_5 = arith.constant 0 : index
    %5 = vector.load %arg4[%c0_4, %c0_5] : memref<128x128xf32, #tpu.memory_space<vmem>>, vector<128x128xf32>
    %cst = arith.constant dense<0.000000e+00> : vector<8x128xf32>
    %6 = tpu.matmul %4, %5, %cst {dimension_numbers = #tpu.dot_dimension_numbers<[1], [1], [0], [0], [0, 0, 1, 0], [], []>} : vector<8x128xf32>, vector<128x128xf32>, vector<8x128xf32> -> vector<8x128xf32>
    %7 = arith.addf %3, %6 : vector<8x128xf32>
    %c0_6 = arith.constant 0 : index
    %c0_7 = arith.constant 0 : index
    %8 = vector.load %arg7[%c0_6, %c0_7] : memref<8x128xf32, #tpu.memory_space<vmem>>, vector<8x128xf32>
    tpu.vector_store %arg7[%c0_6, %c0_7], %7 {strides = array<i32>} : memref<8x128xf32, #tpu.memory_space<vmem>>, vector<8x128xf32>,
    %c0_i32_8 = arith.constant 0 : i32
    %9 = arith.cmpi eq, %arg2, %c0_i32_8 : i32
    %10 = arith.extui %9 : i1 to i32
    %c0_i32_9 = arith.constant 0 : i32
    %11 = arith.cmpi ne, %10, %c0_i32_9 : i32
    scf.if %11 {
      %c0_10 = arith.constant 0 : index
      %c0_11 = arith.constant 0 : index
      %12 = vector.load %arg7[%c0_10, %c0_11] : memref<8x128xf32, #tpu.memory_space<vmem>>, vector<8x128xf32>
      %c0_12 = arith.constant 0 : index
      %c0_13 = arith.constant 0 : index
      %13 = vector.load %arg5[%c0_12, %c0_13] : memref<1x128xf32, #tpu.memory_space<vmem>>, vector<1x128xf32>
      %14 = vector.broadcast %13 : vector<1x128xf32> to vector<8x128xf32>
      %15 = arith.addf %12, %14 : vector<8x128xf32>
      %c0_14 = arith.constant 0 : index
      %c0_15 = arith.constant 0 : index
      %16 = vector.load %arg6[%c0_14, %c0_15] : memref<8x128xf32, #tpu.memory_space<vmem>>, vector<8x128xf32>
      tpu.vector_store %arg6[%c0_14, %c0_15], %15 {strides = array<i32>} : memref<8x128xf32, #tpu.memory_space<vmem>>, vector<8x128xf32>,
    } else {
    }
    return
  }
  func.func @transform_0(%arg0: i32, %arg1: i32, %arg2: i32) -> (i32, i32) {
    %c0_i32 = arith.constant 0 : i32
    return %arg0, %arg2 : i32, i32
  }
  func.func @transform_1(%arg0: i32, %arg1: i32, %arg2: i32) -> (i32, i32) {
    %c0_i32 = arith.constant 0 : i32
    return %arg1, %arg2 : i32, i32
  }
  func.func @transform_2(%arg0: i32, %arg1: i32, %arg2: i32) -> (i32, i32) {
    %c0_i32 = arith.constant 0 : i32
    %c0_i32_0 = arith.constant 0 : i32
    return %c0_i32, %arg1 : i32, i32
  }
  func.func @transform_3(%arg0: i32, %arg1: i32, %arg2: i32) -> (i32, i32) {
    %c0_i32 = arith.constant 0 : i32
    return %arg0, %arg1 : i32, i32
  }
}

</mosaic_0001>

<bundles_post_ra>
// kernel: simple_policy_forward.1
= control target key start
LH: loop header
LB: loop body
LE: loop exit
PB: predicated region body
PF: predicated region fallthrough
CT: control target
= control target key end

     0   :  { %v242_v2 = vmov 0.0|0.0   ;;  %vm243_vm0 = vmmov 0   ;;  %v244_v4 = vmov 0.0   ;;  %s332_s0 = inlined_call_operand.vmem [shape: f32[8,128], index: 0, kind: input, shape index: {}]   ;;  %s333_s1 = inlined_call_operand.vmem [shape: f32[128,128], index: 1, kind: input, shape index: {}]   ;;  %s334_s2 = inlined_call_operand.vmem [shape: f32[1,128], index: 2, kind: input, shape index: {}]   ;;  %s335_s3 = inlined_call_operand.hbm [shape: f32[8,128], index: 3, kind: output, shape index: {}]  }
   0x1   :  { %v22_v0 = vld [vmem:[%s333_s1] sm:$0xff]  ;;  %v23_v1 = vld [vmem:[%s333_s1 + $0x8] sm:$0xff]  ;;  %190 = vmatprep.subr.bf16.mxu0 %v242_v2  ;;  %187 = vmatprep.mubr.msk.f32.mxu0 %vm243_vm0, %v244_v4  ;;  %v24_v5 = vld [vmem:[%s333_s1 + $0x10] sm:$0xff] }
   0x2   :  { %v191_v3 = vpack.c.bf16 %v23_v1, %v22_v0  ;;  %v25_v6 = vld [vmem:[%s333_s1 + $0x18] sm:$0xff] }
   0x4   :  { %192 = vmatpush3.bf16.xpose.msra.mxu0 %v191_v3 }
   0x5   :  { %193 = vmatprep.subr.bf16.mxu0 %v242_v2 }
   0x6   :  { %8 = vsyncpa [#allocation4], 0  ;;  %v194_v7 = vpack.c.bf16 %v25_v6, %v24_v5  ;;  %v26_v8 = vld [vmem:[%s333_s1 + $0x20] sm:$0xff]  ;;  %v27_v9 = vld [vmem:[%s333_s1 + $0x28] sm:$0xff]  ;;  %s245_s21 = smov [#allocation3]  }
   0x7   :  { %v197_v10 = vpack.c.bf16 %v27_v9, %v26_v8  ;;  %v28_v11 = vld [vmem:[%s333_s1 + $0x30] sm:$0xff]  ;;  %v29_v12 = vld [vmem:[%s333_s1 + $0x38] sm:$0xff]  ;;  %v30_v14 = vld [vmem:[%s333_s1 + $0x40] sm:$0xff]  ;;  %s129_s22 = sshll.u32 %s245_s21, 4  ;;  %s130_s22 = int_to_ptr.vmem [resolvable:$true] %s129_s22 }
   0x8   :  { %v200_v13 = vpack.c.bf16 %v29_v12, %v28_v11  ;;  %v31_v15 = vld [vmem:[%s333_s1 + $0x48] sm:$0xff]  ;;  %v32_v17 = vld [vmem:[%s333_s1 + $0x50] sm:$0xff]  ;;  %v33_v18 = vld [vmem:[%s333_s1 + $0x58] sm:$0xff]  ;;  %s218_s23 = scalar_lea.vmem %s130_s22, 128  ;;  %p223_p1 = scmp.lt.s32.totalorder %s130_s22, %s130_s22 }
   0x9   :  { %v203_v16 = vpack.c.bf16 %v31_v15, %v30_v14  ;;  %v206_v19 = vpack.c.bf16 %v33_v18, %v32_v17  ;;  %v34_v20 = vld [vmem:[%s333_s1 + $0x60] sm:$0xff]  ;;  %v35_v21 = vld [vmem:[%s333_s1 + $0x68] sm:$0xff]  ;;  %v36_v23 = vld [vmem:[%s333_s1 + $0x70] sm:$0xff]  ;;  %p219_p0 = scmp.ne.s32.totalorder %s130_s22, %s218_s23  ;;  %p224_p2 = scmp.lt.s32.totalorder %s218_s23, %s218_s23 }
   0xa   :  { %v209_v22 = vpack.c.bf16 %v35_v21, %v34_v20  ;;  %v37_v24 = vld [vmem:[%s333_s1 + $0x78] sm:$0xff]  ;;  %v21_v26 = vld [vmem:[%s332_s0] sm:$0xff] }
   0xb   :  { %v212_v25 = vpack.c.bf16 %v37_v24, %v36_v23  ;;  %v137_v27 = vld [vmem:[%s334_s2] ss:$0 sm:$0xff]  ;;  %p225_p3 = por %p224_p2, %p223_p1 }
   0xc   :  { %195 = vmatpush3.bf16.xpose.msra.mxu0 %v194_v7 }
   0xd   :  { %196 = vmatprep.subr.bf16.mxu0 %v242_v2  ;;  %p226_p4 = pnand %p225_p3, %p219_p0 }
  0x14   :  { %198 = vmatpush3.bf16.xpose.msra.mxu0 %v197_v10 }
  0x15   :  { %199 = vmatprep.subr.bf16.mxu0 %v242_v2 }
  0x1c   :  { %201 = vmatpush3.bf16.xpose.msra.mxu0 %v200_v13 }
  0x1d   :  { %202 = vmatprep.subr.bf16.mxu0 %v242_v2 }
  0x24   :  { %204 = vmatpush3.bf16.xpose.msra.mxu0 %v203_v16 }
  0x25   :  { %205 = vmatprep.subr.bf16.mxu0 %v242_v2 }
  0x2c   :  { %207 = vmatpush3.bf16.xpose.msra.mxu0 %v206_v19 }
  0x2d   :  { %208 = vmatprep.subr.bf16.mxu0 %v242_v2 }
  0x34   :  { %210 = vmatpush3.bf16.xpose.msra.mxu0 %v209_v22 }
  0x35   :  { %211 = vmatprep.subr.bf16.mxu0 %v242_v2 }
  0x3c   :  { %213 = vmatpush3.bf16.xpose.msra.mxu0 %v212_v25 }
  0x43   :  { %188 = vmatmul.mubr.f32.vlgmr.msra.gmra.mrb[0].mxu0 %v21_v26 }
 0x116   :  { %v104_v28 = vpop.f32.mrb[0].mxu0 }
 0x117   :  { %v121_v29 = vadd.f32 %v137_v27, %v104_v28  ;;  %v189_v30 = vpop.f32.mrb[1].mxu0 }
 0x119   :  { %122 = vst [vmem:[#allocation3] sm:$0xff] %v121_v29 }
 0x11a   :  { %229 = shalt.err (!%p226_p4)
}
 0x11b   :  { %s230_s24 = scalar_lea.hbm %s335_s3, 128 }
 0x11c   :  { %p231_p5 = scmp.ne.s32.totalorder %s335_s3, %s230_s24  ;;  %p234_p6 = scmp.lt.u32.totalorder %s230_s24, %s335_s3 }
 0x11e   :  { %p236_p7 = pnand %p234_p6, %p231_p5 }
 0x120   :  { %239 = shalt.err (!%p236_p7)
}
 0x121   :  { %132 = dma.vmem_to_hbm [thread:$0]  %s130_s22, 128, %s335_s3, [#allocation4]  }
 0x122   :  { %240 = dma.done.wait [#allocation4], 128  }
 0x123   :  { %241 = vsyncadd [#allocation4], 4294967168 }
 0x124   :  { %136 = vsyncpa [#allocation4], 1 }

</bundles_post_ra>
